<compile_context>
chip_gen: v5e
topology: v5e:2x2
jax: 0.10.0
libtpu: 0.0.40
codegen_flags: <defaults>
</compile_context>

<pallas_src>
import functools

import jax
import jax.numpy as jnp
from jax.experimental import pallas as pl
from jax.experimental.pallas import tpu as pltpu


def _custom_loss_kernel(logits_ref, target_ref, ce_out, hit_out,
                        ce_acc, hit_acc, *,
                        n_rows, tile_rows, tiles_per_core, bf16_compute):
    core = pl.program_id(0)          # leading "parallel" axis (megacore split)
    j = pl.program_id(1)             # inner "arbitrary" reduction axis

    @pl.when(j == 0)
    def _init():
        ce_acc[...] = jnp.zeros_like(ce_acc)
        hit_acc[...] = jnp.zeros_like(hit_acc)

    logits = logits_ref[...]                              # (TN, C) native dtype
    if not bf16_compute:
        logits = logits.astype(jnp.float32)
    tgt = target_ref[...]                                 # (TN, 1) i32
    tn, c = logits.shape

    # Logical (unclamped) tile index: rows past the true batch size — either
    # the partial last tile or a clamped overflow tile of the core split —
    # are masked out of both reductions.
    tile_idx = core * tiles_per_core + j
    row = tile_idx * tile_rows + jax.lax.broadcasted_iota(jnp.int32, (tn, 1), 0)
    valid = row < n_rows                                  # (TN, 1) bool

    # ---- cross-entropy partial sum (numerically stable, shifted domain) ----
    row_max = jnp.max(logits, axis=-1, keepdims=True)     # (TN, 1)
    shifted = logits - row_max                            # (TN, C), compute dtype
    sum_exp = jnp.sum(jnp.exp(shifted), axis=-1, keepdims=True,
                      dtype=jnp.float32)                  # (TN, 1) f32 accumulate
    lse = jnp.log(sum_exp)                                # (TN, 1) f32

    col = jax.lax.broadcasted_iota(jnp.int32, (tn, c), 1)
    onehot = col == tgt
    tgt_shifted = jnp.sum(jnp.where(onehot, shifted, 0), axis=-1,
                          keepdims=True, dtype=jnp.float32)   # (TN, 1) f32

    per_sample = lse - tgt_shifted                        # = -log p[target]
    # jnp.where (select), NOT per_sample * valid: padded rows may hold
    # NaN/Inf garbage that must not leak into the accumulator.
    per_sample = jnp.where(valid, per_sample, 0.0)
    ce_acc[...] += jnp.sum(per_sample, axis=0, keepdims=True)     # (1, 1)

    # ---- hit flag: any(target==2 and argmax(output)==3) over valid rows ----
    # Direct "class-3 wins" check (no full-width argmax): class 3 holds the
    # row max and, to preserve torch.argmax first-occurrence tie semantics,
    # none of classes 0..2 reaches it (strict <); ties with classes > 3 count.
    if c >= 4:
        v3 = logits[:, 3:4]                                           # (TN, 1)
        pre_max = jnp.max(logits[:, :3], axis=-1, keepdims=True)      # (TN, 1)
        class3_wins = jnp.logical_and(v3 == row_max, pre_max < row_max)
        cond = jnp.logical_and(jnp.logical_and(tgt == 2, class3_wins), valid)
        hit_acc[...] = jnp.maximum(
            hit_acc[...],
            jnp.max(cond.astype(jnp.float32), axis=0, keepdims=True))
    # else: argmax == 3 is impossible when C < 4; hit stays 0.

    # ---- write this core's partials on its last step ----
    @pl.when(j == pl.num_programs(1) - 1)
    def _finalize():
        ce_out[...] = ce_acc[...].reshape(1, 1, 1)
        hit_out[...] = hit_acc[...].reshape(1, 1, 1)


def _device_kind():
    try:
        return jax.devices()[0].device_kind.lower()
    except Exception:
        return ""


def _pick_tile(n, dtype, kind):
    """Batch-tile rows: big enough to amortize ~0.35us/step pipeline overhead,
    small enough that double-buffered (TN, C) tiles + f32 temporaries fit the
    per-generation VMEM budget (v7x: 64 MiB physical per core)."""
    itemsize = jnp.dtype(dtype).itemsize
    if itemsize <= 2:
        cap = 1024                                   # bf16: half the bytes/row
    else:
        cap = 1024 if "v6" in kind else 512          # v7x/v5e stay at 512 f32
    if n <= cap:
        return n                                     # single full-extent tile
    mult = 8 if itemsize >= 4 else 32 // itemsize    # sublane packing multiple
    return max(mult, (cap // mult) * mult)


def custom_loss(output, target, epoch, *, tile_rows=None, bf16_compute=None):
    """output: [N, C] logits (f32 or bf16), target: [N] int labels, epoch: scalar."""
    n, c = output.shape
    kind = _device_kind()
    if tile_rows is None:
        tile_rows = _pick_tile(n, output.dtype, kind)
    if bf16_compute is None:
        # bf16 EUP/VPU path only where it exists (v6e/v7x); never on v5e.
        bf16_compute = (output.dtype == jnp.bfloat16) and ("v5" not in kind)
    bf16_compute = bool(bf16_compute) and output.dtype == jnp.bfloat16

    target2d = target.astype(jnp.int32).reshape(n, 1)

    n_tiles = pl.cdiv(n, tile_rows)
    n_split = 2 if n_tiles >= 2 else 1          # v7x: shard batch over both TCs
    tiles_per_core = pl.cdiv(n_tiles, n_split)

    def tile_map(core, j):
        # Clamp overflow steps of the core split to the last real tile; the
        # kernel masks them out via the unclamped logical row index (and the
        # repeated block index means no extra DMA for the clamped step).
        return (jnp.minimum(core * tiles_per_core + j, n_tiles - 1), 0)

    kernel = functools.partial(
        _custom_loss_kernel, n_rows=n, tile_rows=tile_rows,
        tiles_per_core=tiles_per_core, bf16_compute=bf16_compute)

    itemsize = jnp.dtype(output.dtype).itemsize
    cost = pl.CostEstimate(
        flops=6 * n * c,
        transcendentals=n * c + n,
        bytes_accessed=n * c * itemsize + n * 4 + 8 * n_split)

    vmem_limit = (48 << 20) if "v7" in kind else (64 << 20)

    ce_parts, hit_parts = pl.pallas_call(
        kernel,
        out_shape=(jax.ShapeDtypeStruct((n_split, 1, 1), jnp.float32),
                   jax.ShapeDtypeStruct((n_split, 1, 1), jnp.float32)),
        grid_spec=pltpu.PrefetchScalarGridSpec(
            num_scalar_prefetch=0,
            grid=(n_split, tiles_per_core),
            in_specs=[
                pl.BlockSpec((tile_rows, c), tile_map),   # logits tile (native dtype)
                pl.BlockSpec((tile_rows, 1), tile_map),   # target tile
            ],
            out_specs=(
                pl.BlockSpec((1, 1, 1), lambda core, j: (core, 0, 0)),
                pl.BlockSpec((1, 1, 1), lambda core, j: (core, 0, 0)),
            ),
            scratch_shapes=[
                pltpu.VMEM((1, 1), jnp.float32),   # per-core CE partial sum
                pltpu.VMEM((1, 1), jnp.float32),   # per-core hit flag
            ],
        ),
        compiler_params=pltpu.CompilerParams(
            dimension_semantics=("parallel", "arbitrary"),
            vmem_limit_bytes=vmem_limit),
        cost_estimate=cost,
    )(output, target2d)

    # correction_increase = epoch**(-0.65) / 4**(-3) + 0.01 (wrapper-side).
    correction = jnp.asarray(epoch, jnp.float32) ** (-0.65) * 64.0 + 0.01
    ce = jnp.sum(ce_parts) / jnp.float32(n)
    hit = jnp.max(hit_parts)                    # 0.0 or 1.0
    return ce + hit * correction


def _reference(output, target, epoch):
    # Plain-JAX reference for sanity checking.
    logp = jax.nn.log_softmax(output.astype(jnp.float32), axis=-1)
    ce = -jnp.mean(logp[jnp.arange(output.shape[0]), target])
    amax = jnp.argmax(output, axis=-1)
    hit = jnp.any(jnp.logical_and(target == 2, amax == 3))
    corr = float(epoch) ** (-0.65) / (4.0 ** (-3)) + 0.01
    return ce + jnp.where(hit, corr, 0.0)


if __name__ == "__main__":
    key = jax.random.PRNGKey(0)
    k1, k2, k3, k4 = jax.random.split(key, 4)

    # Small case; correction branch forced on (target 2, argmax 3 at row 0).
    n, c = 8, 10
    output = jax.random.normal(k1, (n, c), dtype=jnp.float32)
    target = jax.random.randint(k2, (n,), 0, c, dtype=jnp.int32)
    target = target.at[0].set(2)
    output = output.at[0, 3].set(10.0)
    epoch = 3

    loss = custom_loss(output, target, epoch)
    jax.block_until_ready(loss)
    ref = _reference(output, target, epoch)
    assert jnp.allclose(loss, ref, rtol=1e-5, atol=1e-5), (loss, ref)

    # Tiled path: partial last tile + 2-core batch split; hit lands in the
    # second core's tile (row 290) to exercise the cross-core combine.
    n2, c2 = 300, 16
    out2 = jax.random.normal(k3, (n2, c2), dtype=jnp.float32)
    tgt2 = jax.random.randint(k4, (n2,), 0, c2, dtype=jnp.int32)
    tgt2 = tgt2.at[290].set(2)
    out2 = out2.at[290, 3].set(30.0)
    loss2 = custom_loss(out2, tgt2, 5, tile_rows=128)
    jax.block_until_ready(loss2)
    ref2 = _reference(out2, tgt2, 5)
    assert jnp.allclose(loss2, ref2, rtol=1e-5, atol=1e-5), (loss2, ref2)

    # bf16 logits: exercises the native-dtype softmax path (auto-disabled on v5e).
    out3 = jax.random.normal(k1, (256, 32), dtype=jnp.bfloat16)
    tgt3 = jax.random.randint(k2, (256,), 0, 32, dtype=jnp.int32)
    loss3 = custom_loss(out3, tgt3, 4, tile_rows=128)
    jax.block_until_ready(loss3)
    ref3 = _reference(out3, tgt3, 4)
    assert jnp.allclose(loss3, ref3, rtol=3e-2, atol=3e-2), (loss3, ref3)

    print("KERNEL_OK")
</pallas_src>

<mosaic_0001>
module attributes {stable_mosaic.version = 11 : i64} {
  func.func @_custom_loss_kernel(%arg0: i32, %arg1: i32, %arg2: memref<8x10xf32, #tpu.memory_space<vmem>>, %arg3: memref<8x1xi32, #tpu.memory_space<vmem>>, %arg4: memref<1x1x1xf32, #tpu.memory_space<vmem>>, %arg5: memref<1x1x1xf32, #tpu.memory_space<vmem>>, %arg6: memref<1x1xf32, #tpu.memory_space<vmem>>, %arg7: memref<1x1xf32, #tpu.memory_space<vmem>>) attributes {dimension_semantics = [#tpu.dimension_semantics<parallel>, #tpu.dimension_semantics<arbitrary>], iteration_bounds = array<i64: 1, 1>, scalar_prefetch = 0 : i64, scratch_operands = 2 : i64, tpu.core_type = #tpu.core_type<tc>, window_params = [{transform_indices = @transform_0, window_bounds = array<i64: 8, 10>}, {transform_indices = @transform_1, window_bounds = array<i64: 8, 1>}, {transform_indices = @transform_2, window_bounds = array<i64: 1, 1, 1>}, {transform_indices = @transform_3, window_bounds = array<i64: 1, 1, 1>}]} {
    %c0_i32 = arith.constant 0 : i32
    %0 = arith.cmpi eq, %arg1, %c0_i32 : i32
    %1 = arith.extui %0 : i1 to i32
    %c0_i32_0 = arith.constant 0 : i32
    %2 = arith.cmpi ne, %1, %c0_i32_0 : i32
    scf.if %2 {
      %cst_22 = arith.constant 0.000000e+00 : f32
      %58 = vector.broadcast %cst_22 : f32 to vector<1x1xf32>
      %c0_23 = arith.constant 0 : index
      %c0_24 = arith.constant 0 : index
      %59 = vector.load %arg6[%c0_23, %c0_24] : memref<1x1xf32, #tpu.memory_space<vmem>>, vector<1x1xf32>
      tpu.vector_store %arg6[%c0_23, %c0_24], %58 {strides = array<i32>} : memref<1x1xf32, #tpu.memory_space<vmem>>, vector<1x1xf32>,
      %cst_25 = arith.constant 0.000000e+00 : f32
      %60 = vector.broadcast %cst_25 : f32 to vector<1x1xf32>
      %c0_26 = arith.constant 0 : index
      %c0_27 = arith.constant 0 : index
      %61 = vector.load %arg7[%c0_26, %c0_27] : memref<1x1xf32, #tpu.memory_space<vmem>>, vector<1x1xf32>
      tpu.vector_store %arg7[%c0_26, %c0_27], %60 {strides = array<i32>} : memref<1x1xf32, #tpu.memory_space<vmem>>, vector<1x1xf32>,
    } else {
    }
    %c0 = arith.constant 0 : index
    %c0_1 = arith.constant 0 : index
    %3 = vector.load %arg2[%c0, %c0_1] : memref<8x10xf32, #tpu.memory_space<vmem>>, vector<8x10xf32>
    %c0_2 = arith.constant 0 : index
    %c0_3 = arith.constant 0 : index
    %4 = vector.load %arg3[%c0_2, %c0_3] : memref<8x1xi32, #tpu.memory_space<vmem>>, vector<8x1xi32>
    %c1_i32 = arith.constant 1 : i32
    %5 = arith.muli %arg0, %c1_i32 : i32
    %6 = arith.addi %5, %arg1 : i32
    %c8_i32 = arith.constant 8 : i32
    %7 = arith.muli %6, %c8_i32 : i32
    %8 = tpu.iota {dimensions = array<i32: 0>} : vector<8x1xi32>
    %9 = vector.broadcast %7 : i32 to vector<8x1xi32>
    %10 = arith.addi %9, %8 : vector<8x1xi32>
    %c8_i32_4 = arith.constant 8 : i32
    %11 = vector.broadcast %c8_i32_4 : i32 to vector<8x1xi32>
    %12 = arith.cmpi slt, %10, %11 : vector<8x1xi32>
    %cst = arith.constant dense<0xFF800000> : vector<8xf32>
    %13 = vector.multi_reduction <maximumf>, %3, %cst [1] : vector<8x10xf32> to vector<8xf32>
    %14 = vector.shape_cast %13 : vector<8xf32> to vector<8x1xf32>
    %15 = vector.broadcast %14 : vector<8x1xf32> to vector<8x10xf32>
    %16 = arith.subf %3, %15 : vector<8x10xf32>
    %17 = math.exp %16 : vector<8x10xf32>
    %cst_5 = arith.constant dense<0.000000e+00> : vector<8xf32>
    %18 = vector.multi_reduction <add>, %17, %cst_5 [1] : vector<8x10xf32> to vector<8xf32>
    %19 = vector.shape_cast %18 : vector<8xf32> to vector<8x1xf32>
    %20 = math.log %19 : vector<8x1xf32>
    %21 = tpu.iota {dimensions = array<i32: 1>} : vector<8x10xi32>
    %22 = vector.broadcast %4 : vector<8x1xi32> to vector<8x10xi32>
    %23 = arith.cmpi eq, %21, %22 : vector<8x10xi32>
    %c0_i32_6 = arith.constant 0 : i32
    %24 = arith.sitofp %c0_i32_6 : i32 to f32
    %25 = vector.broadcast %24 : f32 to vector<8x10xf32>
    %26 = arith.select %23, %16, %25 : vector<8x10xi1>, vector<8x10xf32>
    %cst_7 = arith.constant dense<0.000000e+00> : vector<8xf32>
    %27 = vector.multi_reduction <add>, %26, %cst_7 [1] : vector<8x10xf32> to vector<8xf32>
    %28 = vector.shape_cast %27 : vector<8xf32> to vector<8x1xf32>
    %29 = arith.subf %20, %28 : vector<8x1xf32>
    %cst_8 = arith.constant 0.000000e+00 : f32
    %30 = vector.broadcast %cst_8 : f32 to vector<8x1xf32>
    %31 = arith.select %12, %29, %30 : vector<8x1xi1>, vector<8x1xf32>
    %c0_9 = arith.constant 0 : index
    %c0_10 = arith.constant 0 : index
    %32 = vector.load %arg6[%c0_9, %c0_10] : memref<1x1xf32, #tpu.memory_space<vmem>>, vector<1x1xf32>
    %cst_11 = arith.constant dense<0.000000e+00> : vector<1xf32>
    %33 = vector.multi_reduction <add>, %31, %cst_11 [0] : vector<8x1xf32> to vector<1xf32>
    %34 = vector.shape_cast %33 : vector<1xf32> to vector<1x1xf32>
    %35 = arith.addf %32, %34 : vector<1x1xf32>
    %c0_12 = arith.constant 0 : index
    %c0_13 = arith.constant 0 : index
    %36 = vector.load %arg6[%c0_12, %c0_13] : memref<1x1xf32, #tpu.memory_space<vmem>>, vector<1x1xf32>
    tpu.vector_store %arg6[%c0_12, %c0_13], %35 {strides = array<i32>} : memref<1x1xf32, #tpu.memory_space<vmem>>, vector<1x1xf32>,
    %37 = vector.extract_strided_slice %3 {offsets = [0, 3], sizes = [8, 1], strides = [1, 1]} : vector<8x10xf32> to vector<8x1xf32>
    %38 = vector.extract_strided_slice %3 {offsets = [0, 0], sizes = [8, 3], strides = [1, 1]} : vector<8x10xf32> to vector<8x3xf32>
    %cst_14 = arith.constant dense<0xFF800000> : vector<8xf32>
    %39 = vector.multi_reduction <maximumf>, %38, %cst_14 [1] : vector<8x3xf32> to vector<8xf32>
    %40 = vector.shape_cast %39 : vector<8xf32> to vector<8x1xf32>
    %41 = arith.cmpf oeq, %37, %14 : vector<8x1xf32>
    %42 = arith.cmpf olt, %40, %14 : vector<8x1xf32>
    %43 = arith.andi %41, %42 : vector<8x1xi1>
    %c2_i32 = arith.constant 2 : i32
    %44 = vector.broadcast %c2_i32 : i32 to vector<8x1xi32>
    %45 = arith.cmpi eq, %4, %44 : vector<8x1xi32>
    %46 = arith.andi %45, %43 : vector<8x1xi1>
    %47 = arith.andi %46, %12 : vector<8x1xi1>
    %c0_15 = arith.constant 0 : index
    %c0_16 = arith.constant 0 : index
    %48 = vector.load %arg7[%c0_15, %c0_16] : memref<1x1xf32, #tpu.memory_space<vmem>>, vector<1x1xf32>
    %49 = arith.extui %47 : vector<8x1xi1> to vector<8x1xi32>
    %50 = arith.sitofp %49 : vector<8x1xi32> to vector<8x1xf32>
    %cst_17 = arith.constant dense<0xFF800000> : vector<1xf32>
    %51 = vector.multi_reduction <maximumf>, %50, %cst_17 [0] : vector<8x1xf32> to vector<1xf32>
    %52 = vector.shape_cast %51 : vector<1xf32> to vector<1x1xf32>
    %53 = arith.maximumf %48, %52 : vector<1x1xf32>
    %c0_18 = arith.constant 0 : index
    %c0_19 = arith.constant 0 : index
    %54 = vector.load %arg7[%c0_18, %c0_19] : memref<1x1xf32, #tpu.memory_space<vmem>>, vector<1x1xf32>
    tpu.vector_store %arg7[%c0_18, %c0_19], %53 {strides = array<i32>} : memref<1x1xf32, #tpu.memory_space<vmem>>, vector<1x1xf32>,
    %c0_i32_20 = arith.constant 0 : i32
    %55 = arith.cmpi eq, %arg1, %c0_i32_20 : i32
    %56 = arith.extui %55 : i1 to i32
    %c0_i32_21 = arith.constant 0 : i32
    %57 = arith.cmpi ne, %56, %c0_i32_21 : i32
    scf.if %57 {
      %c0_22 = arith.constant 0 : index
      %c0_23 = arith.constant 0 : index
      %58 = vector.load %arg6[%c0_22, %c0_23] : memref<1x1xf32, #tpu.memory_space<vmem>>, vector<1x1xf32>
      %59 = vector.shape_cast %58 : vector<1x1xf32> to vector<1x1x1xf32>
      %c0_24 = arith.constant 0 : index
      %c0_25 = arith.constant 0 : index
      %c0_26 = arith.constant 0 : index
      %60 = vector.load %arg4[%c0_24, %c0_25, %c0_26] : memref<1x1x1xf32, #tpu.memory_space<vmem>>, vector<1x1x1xf32>
      tpu.vector_store %arg4[%c0_24, %c0_25, %c0_26], %59 {strides = array<i32>} : memref<1x1x1xf32, #tpu.memory_space<vmem>>, vector<1x1x1xf32>,
      %c0_27 = arith.constant 0 : index
      %c0_28 = arith.constant 0 : index
      %61 = vector.load %arg7[%c0_27, %c0_28] : memref<1x1xf32, #tpu.memory_space<vmem>>, vector<1x1xf32>
      %62 = vector.shape_cast %61 : vector<1x1xf32> to vector<1x1x1xf32>
      %c0_29 = arith.constant 0 : index
      %c0_30 = arith.constant 0 : index
      %c0_31 = arith.constant 0 : index
      %63 = vector.load %arg5[%c0_29, %c0_30, %c0_31] : memref<1x1x1xf32, #tpu.memory_space<vmem>>, vector<1x1x1xf32>
      tpu.vector_store %arg5[%c0_29, %c0_30, %c0_31], %62 {strides = array<i32>} : memref<1x1x1xf32, #tpu.memory_space<vmem>>, vector<1x1x1xf32>,
    } else {
    }
    return
  }
  func.func @transform_0(%arg0: i32, %arg1: i32) -> (i32, i32) {
    %c1_i32 = arith.constant 1 : i32
    %0 = arith.muli %arg0, %c1_i32 : i32
    %1 = arith.addi %0, %arg1 : i32
    %c0_i32 = arith.constant 0 : i32
    %2 = arith.minsi %1, %c0_i32 : i32
    %c0_i32_0 = arith.constant 0 : i32
    %c0_i32_1 = arith.constant 0 : i32
    return %2, %c0_i32_0 : i32, i32
  }
  func.func @transform_1(%arg0: i32, %arg1: i32) -> (i32, i32) {
    %c1_i32 = arith.constant 1 : i32
    %0 = arith.muli %arg0, %c1_i32 : i32
    %1 = arith.addi %0, %arg1 : i32
    %c0_i32 = arith.constant 0 : i32
    %2 = arith.minsi %1, %c0_i32 : i32
    %c0_i32_0 = arith.constant 0 : i32
    %c0_i32_1 = arith.constant 0 : i32
    return %2, %c0_i32_0 : i32, i32
  }
  func.func @transform_2(%arg0: i32, %arg1: i32) -> (i32, i32, i32) {
    %c0_i32 = arith.constant 0 : i32
    %c0_i32_0 = arith.constant 0 : i32
    %c0_i32_1 = arith.constant 0 : i32
    return %arg0, %c0_i32, %c0_i32_0 : i32, i32, i32
  }
  func.func @transform_3(%arg0: i32, %arg1: i32) -> (i32, i32, i32) {
    %c0_i32 = arith.constant 0 : i32
    %c0_i32_0 = arith.constant 0 : i32
    %c0_i32_1 = arith.constant 0 : i32
    return %arg0, %c0_i32, %c0_i32_0 : i32, i32, i32
  }
}

</mosaic_0001>

<bundles_post_ra>
// kernel: tpu_custom_call.1
= control target key start
LH: loop header
LB: loop body
LE: loop exit
PB: predicated region body
PF: predicated region fallthrough
CT: control target
= control target key end

     0   :  { %9 = vsyncpa [#allocation5], 0  ;;  %vm85_vm0 = vcmask 80896   ;;  %v261_v3 = vmov 0   ;;  %s307_s0 = inlined_call_operand.vmem [shape: f32[8,10], index: 0, kind: input, shape index: {}]   ;;  %s308_s1 = inlined_call_operand.vmem [shape: s32[8,1], index: 1, kind: input, shape index: {}]   ;;  %s309_s2 = inlined_call_operand.hbm [shape: f32[1,1,1], index: 2, kind: output, shape index: {0}]   ;;  %s310_s3 = inlined_call_operand.hbm [shape: f32[1,1,1], index: 3, kind: output, shape index: {1}]  }
   0x1   :  { %v76_v0 = vld [vmem:[%s307_s0] sm:$0xff]  ;;  %203 = vset.pattern.permute.xlu1 %v261_v3  ;;  %204 = vset.pattern.permute.xlu0 %v261_v3 }
   0x2   :  { %v77_v1 = vld [vmem:[%s308_s1] sm:$0xff]  ;;  %v86_v2 = vsel %vm85_vm0, %v76_v0, -inf }
   0x3   :  { %10 = vsyncpa [#allocation7], 0  ;;  %87 = vmax.xlane.f32.xlu0 %v86_v2  ;;  %100 = vperm.xlu1 %203, %v77_v1   ;;  %vm119_vm1 = vcmask 23552   ;;  %s262_s0 = smov 125   ;;  %v97_v12 = vlaneseq  ;;  %vm73_vm6 = vcmask 0   ;;  %v263_v17 = vmov 0.0  }
   0x4   :  { %v120_v4 = vsel %vm119_vm1, %v76_v0, -inf  ;;  %74 = vst.msk [vmem:[#allocation2] sm:$0x1] %vm73_vm6, %v263_v17  ;;  %vm126_vm7 = vcmp.eq.s32.totalorder %v77_v1, 2  ;;  %vm136_vm8 = vcmask 7168   ;;  %s264_s1 = smov [#allocation6]  }
   0x5   :  { %v98_v13 = vand.u32 127, %v97_v12  ;;  %75 = vst.msk [vmem:[#allocation3] sm:$0x1] %vm73_vm6, %v263_v17  ;;  %s169_s16 = sshll.u32 %s264_s1, 4  ;;  %s171_s19 = sshll.u32 %s310_s3, 4  ;;  %s170_s16 = int_to_ptr.vmem [resolvable:$true] %s169_s16  ;;  %s172_s19 = int_to_ptr.hbm [resolvable:$true] %s171_s19 }
   0x6   :  { %s265_s3 = smov [#allocation4]   ;;  %s160_s23 = sshll.u32 %s309_s2, 4  ;;  %s161_s23 = int_to_ptr.hbm [resolvable:$true] %s160_s23 }
   0x7   :  { %s158_s20 = sshll.u32 %s265_s3, 4  ;;  %s159_s20 = int_to_ptr.vmem [resolvable:$true] %s158_s20 }
   0xb   :  { %121 = vmax.xlane.f32.xlu0 %v120_v4  ;;  %v109_v40 = vld [vmem:[#allocation2] sm:$0x1] }
   0xc   :  { %v133_v26 = vld [vmem:[#allocation3] sm:$0x1] }
  0x75   :  { %v101_v14 = vpop.permute.xlu1 %100 }
  0x76   :  { %v88_v5 = vpop.xlane.xlu0 %87  ;;  %vm102_vm5 = vcmp.eq.s32.totalorder %v98_v13, %v101_v14 }
  0x77   :  { %v89_v6 = vsub.f32 %v76_v0, %v88_v5  ;;  %vm123_vm3 = vcmp.eq.f32.partialorder %v76_v0, %v88_v5 }
  0x79   :  { %v90_v7 = vmul.f32 1.442695, %v89_v6  ;;  %v103_v15 = vsel %vm102_vm5, %v89_v6, 0.0 }
  0x7a   :  { %v104_v16 = vsel %vm85_vm0, %v103_v15, 0.0 }
  0x7b   :  { %205 = vpow2.f32 %v90_v7 }
  0x7e   :  { %v122_v8 = vpop.xlane.xlu0 %121 }
  0x7f   :  { %vm124_vm2 = vcmp.lt.f32.partialorder %v122_v8, %v88_v5 }
  0x80   :  { %vm125_vm4 = vmand %vm123_vm3, %vm124_vm2 }
  0x81   :  { %v206_v9 = vpop.eup %205  ;;  %v127_v10 = vsel %vm125_vm4, 1, %v261_v3 }
  0x82   :  { %128 = vrot.lane.b32.xlu2 %v127_v10, %s262_s0  ;;  %v92_v11 = vsel %vm85_vm0, %v206_v9, 0.0 }
  0x83   :  { %93 = vadd.xlane.f32.xlu1 %v92_v11 }
  0xab   :  { %105 = vadd.xlane.f32.xlu2 %v104_v16 }
  0xdc   :  { %v129_v18 = vpop.permute.xlu2 %128 }
  0xdd   :  { %vm130_vm9 = vcmp.ne.s32.totalorder %v129_v18, 0 }
  0xde   :  { %vm131_vm10 = vmand %vm126_vm7, %vm130_vm9 }
  0xdf   :  { %v197_v19 = vsel %vm131_vm10, 1.0, %v263_v17 }
  0xe0   :  { %v137_v20 = vsel %vm136_vm8, %v197_v19, -inf }
  0xe1   :  { %v138_v21 = vrot.slane %v137_v20, 4 }
  0xe3   :  { %v139_v22 = vmax.f32 %v137_v20, %v138_v21 }
  0xe5   :  { %v140_v23 = vrot.slane %v139_v22, 2 }
  0xe7   :  { %v141_v24 = vmax.f32 %v139_v22, %v140_v23 }
  0xe9   :  { %v142_v25 = vrot.slane %v141_v24, 1 }
  0xeb   :  { %v143_v27 = vmax.f32 %v141_v24, %v142_v25 }
  0xed   :  { %v144_v28 = vmax.f32 %v133_v26, %v143_v27 }
  0xef   :  { %145 = vst.msk [vmem:[#allocation3] sm:$0x1] %vm73_vm6, %v144_v28 }
  0xf6   :  { %v151_v29 = vld [vmem:[#allocation3] sm:$0x1]  ;;  %v94_v30 = vpop.xlane.xlu1 %93 }
  0xf7   :  { %152 = vst.msk [vmem:[#allocation6] sm:$0x1] %vm73_vm6, %v151_v29  ;;  %207 = vlog2.f32 %v94_v30 }
  0xf8   :  { %174 = dma.vmem_to_hbm [thread:$0]  %s170_s16, 16, %s172_s19, [#allocation7]  }
  0xfd   :  { %v208_v31 = vpop.eup %207 }
  0xfe   :  { %v96_v32 = vmul.f32 0.6931472, %v208_v31 }
 0x11e   :  { %v106_v33 = vpop.xlane.xlu2 %105 }
 0x11f   :  { %v107_v34 = vsub.f32 %v96_v32, %v106_v33 }
 0x121   :  { %v110_v35 = vrot.slane %v107_v34, 4 }
 0x123   :  { %v111_v36 = vadd.f32 %v110_v35, %v107_v34 }
 0x125   :  { %v112_v37 = vrot.slane %v111_v36, 2 }
 0x127   :  { %v113_v38 = vadd.f32 %v112_v37, %v111_v36 }
 0x129   :  { %v114_v39 = vrot.slane %v113_v38, 1 }
 0x12b   :  { %v115_v41 = vadd.f32 %v114_v39, %v113_v38 }
 0x12d   :  { %v116_v42 = vadd.f32 %v115_v41, %v109_v40 }
 0x12f   :  { %118 = vst.msk [vmem:[#allocation2] sm:$0x1] %vm73_vm6, %v116_v42 }
 0x136   :  { %v149_v43 = vld [vmem:[#allocation2] sm:$0x1] }
 0x137   :  { %150 = vst.msk [vmem:[#allocation4] sm:$0x1] %vm73_vm6, %v149_v43 }
 0x138   :  { %163 = dma.vmem_to_hbm [thread:$0]  %s159_s20, 16, %s161_s23, [#allocation5]  }
 0x139   :  { %257 = dma.done.wait [#allocation5], 16  }
 0x13a   :  { %258 = vsyncadd [#allocation5], 4294967280 }
 0x13b   :  { %259 = dma.done.wait [#allocation7], 16  }
 0x13c   :  { %260 = vsyncadd [#allocation7], 4294967280 }
 0x13d   :  { %183 = vsyncpa [#allocation5], 1 }
 0x13e   :  { %184 = vsyncpa [#allocation7], 1 }

</bundles_post_ra>
